<compile_context>
chip_gen: v7x
topology: tpu7x:2x2x1
jax: 0.10.0
libtpu: 0.0.40
codegen_flags: <defaults>
</compile_context>

<pallas_src>
import jax
import jax.numpy as jnp
from jax.experimental import pallas as pl
from jax.experimental.pallas import tpu as pltpu

_LANES = 128
_VMEM_TILE_BUDGET = 16 * 1024 * 1024   # double-buffered field tiles, safe on all gens
_MIN_VMEM_LIMIT = 32 * 1024 * 1024
_MAX_VMEM_LIMIT = 100 * 1024 * 1024


def _pick_row_tile(extent: int, lane_elems: int, batch: int) -> int:
    """Largest row-tile that divides `extent`, is a multiple of 8 (or equals
    `extent`), and keeps 4 field planes x 2 pipeline buffers within the VMEM
    tile budget."""
    bytes_per_row = 4 * 2 * batch * lane_elems * 4   # planes * bufs * B * lanes * f32
    max_rows = max(1, _VMEM_TILE_BUDGET // bytes_per_row)
    if extent <= max_rows:
        return extent
    t = (max_rows // 8) * 8
    while t >= 8:
        if extent % t == 0:
            return t
        t -= 8
    # Fallback: no aligned divisor fits the budget; take the whole extent and
    # let the wrapper raise vmem_limit_bytes accordingly.
    return 8 if extent % 8 == 0 else extent


def thin_lens_kernel(coef_ref, xrow_ref, xlane_ref, y2lane_ref,
                     fr_ref, fi_ref, or_ref, oi_ref):
    # coef_ref   : SMEM [C]           -(pi / (lambda_c * focal_length))
    # xrow_ref   : VMEM [TR, 1]       x coordinate of each (packed) row of this tile
    # xlane_ref  : VMEM [1, L]        per-lane x offset (zeros in the plain 2-D layout)
    # y2lane_ref : VMEM [1, L]        per-lane y^2
    # fr/fi      : VMEM [B, 1, TR, L] real / imag planes of the field tile
    coef = coef_ref[pl.program_id(0)]

    xg = xrow_ref[...] + xlane_ref[...]            # (TR, L)
    ang = coef * (xg * xg + y2lane_ref[...])       # (TR, L), phase for this wavelength
    cos_a = jnp.cos(ang)[None, None]               # (1, 1, TR, L) -> reused across B
    sin_a = jnp.sin(ang)[None, None]

    fr = fr_ref[...]                               # (B, 1, TR, L)
    fi = fi_ref[...]
    # (fr + i*fi) * (cos + i*sin)
    or_ref[...] = fr * cos_a - fi * sin_a
    oi_ref[...] = fr * sin_a + fi * cos_a


def thin_lens_apply(field_real, field_imag, wavelengths, spacing, focal_length):
    """Thin-lens phase shift E_out = E_in * exp(i*ang), planar float32 in/out.

    Returns (out_real, out_imag), each [B, C, H, W].  The complex64 combine is
    deliberately NOT done here (it would cost a full extra HBM pass); keep the
    field planar or fuse the combine into the consumer.
    """
    B, C, H, W = field_real.shape
    dx, dy = float(spacing[0]), float(spacing[1])
    coef = -jnp.pi / (wavelengths.astype(jnp.float32) * jnp.float32(focal_length))

    x_half = float((H - 1) // 2)
    y_half = float((W - 1) // 2)
    xc = jnp.linspace(-x_half, x_half, H, dtype=jnp.float32) * dx    # (H,)
    yc = jnp.linspace(-y_half, y_half, W, dtype=jnp.float32) * dy    # (W,)

    lane_dense = (W < _LANES) and (_LANES % W == 0) and (H % (_LANES // W) == 0)
    if lane_dense:
        # View (H, W) as (R, 128): each 128-lane row packs a = 128//W image rows,
        # so stores are full-width vst instead of masked vst.msk.
        a = _LANES // W
        R, L = H // a, _LANES
        xrow = xc[::a].reshape(R, 1)                           # x of first row in each group
        xlane = jnp.repeat(xc[:a] - xc[0], W).reshape(1, L)    # x offset of sub-row in group
        y2lane = jnp.tile(yc * yc, a).reshape(1, L)            # y^2 pattern per sub-row
        fr = field_real.reshape(B, C, R, L)                    # contiguous reshape -> free
        fi = field_imag.reshape(B, C, R, L)
    else:
        R, L = H, W
        xrow = xc.reshape(R, 1)
        xlane = jnp.zeros((1, L), jnp.float32)
        y2lane = (yc * yc).reshape(1, L)
        fr, fi = field_real, field_imag

    TR = _pick_row_tile(R, L, B)
    grid = (C, R // TR)

    # Size the VMEM limit from the actual double-buffered block bytes (4 field
    # planes, 2 pipeline buffers each) plus headroom; clamp to safe bounds.
    block_bytes = 4 * 2 * B * TR * L * 4
    vmem_limit = int(min(_MAX_VMEM_LIMIT,
                         max(_MIN_VMEM_LIMIT, block_bytes + block_bytes // 2)))

    smem_spec = pl.BlockSpec(memory_space=pltpu.MemorySpace.SMEM)
    xrow_spec = pl.BlockSpec((TR, 1), lambda c, t: (t, 0))
    lane_spec = pl.BlockSpec((1, L), lambda c, t: (0, 0))
    field_spec = pl.BlockSpec((B, 1, TR, L), lambda c, t: (0, c, t, 0))
    plane_shape = jax.ShapeDtypeStruct((B, C, R, L), jnp.float32)

    out_r, out_i = pl.pallas_call(
        thin_lens_kernel,
        out_shape=(plane_shape, plane_shape),
        grid_spec=pltpu.PrefetchScalarGridSpec(
            num_scalar_prefetch=0,
            grid=grid,
            in_specs=[smem_spec, xrow_spec, lane_spec, lane_spec,
                      field_spec, field_spec],
            out_specs=(field_spec, field_spec)),
        compiler_params=pltpu.CompilerParams(
            dimension_semantics=("parallel", "parallel"),
            vmem_limit_bytes=vmem_limit),
    )(coef, xrow, xlane, y2lane, fr, fi)

    if lane_dense:
        out_r = out_r.reshape(B, C, H, W)
        out_i = out_i.reshape(B, C, H, W)
    return out_r, out_i


def thin_lens_reference(field, wavelengths, spacing, focal_length):
    """Pure-JAX reference mirroring the PyTorch module."""
    _, C, H, W = field.shape
    dx, dy = float(spacing[0]), float(spacing[1])
    x_half = float((H - 1) // 2)
    y_half = float((W - 1) // 2)
    xC = jnp.linspace(-x_half, x_half, H, dtype=jnp.float32)
    yC = jnp.linspace(-y_half, y_half, W, dtype=jnp.float32)
    xG, yG = jnp.meshgrid(xC, yC, indexing="ij")
    xG = xG[None, None] * dx
    yG = yG[None, None] * dy
    wl = wavelengths[:, None, None].astype(jnp.float32)
    ang = -(jnp.pi / (wl * focal_length)) * (xG ** 2 + yG ** 2)   # [1, C, H, W]
    ker = jnp.exp(1j * ang.astype(jnp.float32))
    return field * ker


def _run_case(key, B, C, H, W):
    k1, k2 = jax.random.split(key)
    fr = jax.random.normal(k1, (B, C, H, W), dtype=jnp.float32)
    fi = jax.random.normal(k2, (B, C, H, W), dtype=jnp.float32)
    wavelengths = jnp.linspace(450e-9, 700e-9, C).astype(jnp.float32)
    spacing = (8e-6, 8e-6)        # (dx, dy) pixel pitch in meters
    focal_length = 0.05           # meters

    out_r, out_i = thin_lens_apply(fr, fi, wavelengths, spacing, focal_length)
    out_r, out_i = jax.block_until_ready((out_r, out_i))

    ref = thin_lens_reference(fr + 1j * fi, wavelengths, spacing, focal_length)
    assert jnp.allclose(out_r, ref.real, atol=1e-4, rtol=1e-4)
    assert jnp.allclose(out_i, ref.imag, atol=1e-4, rtol=1e-4)


if __name__ == "__main__":
    key = jax.random.PRNGKey(0)
    k1, k2 = jax.random.split(key)
    _run_case(k1, 2, 4, 16, 16)    # small-W field -> lane-dense (H*W/128, 128) layout
    _run_case(k2, 2, 3, 16, 128)   # lane-aligned W -> plain (H, W) layout
    print("KERNEL_OK")
</pallas_src>

<mosaic_0001>
module attributes {stable_mosaic.version = 11 : i64} {
  func.func @thin_lens_kernel(%arg0: i32, %arg1: i32, %arg2: memref<4xf32, #tpu.memory_space<smem>>, %arg3: memref<2x1xf32, #tpu.memory_space<vmem>>, %arg4: memref<1x128xf32, #tpu.memory_space<vmem>>, %arg5: memref<1x128xf32, #tpu.memory_space<vmem>>, %arg6: memref<2x1x2x128xf32, #tpu.memory_space<vmem>>, %arg7: memref<2x1x2x128xf32, #tpu.memory_space<vmem>>, %arg8: memref<2x1x2x128xf32, #tpu.memory_space<vmem>>, %arg9: memref<2x1x2x128xf32, #tpu.memory_space<vmem>>) attributes {dimension_semantics = [#tpu.dimension_semantics<parallel>, #tpu.dimension_semantics<parallel>], iteration_bounds = array<i64: 4, 1>, scalar_prefetch = 0 : i64, scratch_operands = 0 : i64, tpu.core_type = #tpu.core_type<tc>, window_params = [{transform_indices = @transform_0, window_bounds = array<i64: 4>}, {transform_indices = @transform_1, window_bounds = array<i64: 2, 1>}, {pipeline_mode = #tpu.pipeline_mode<synchronous>, transform_indices = @transform_2, window_bounds = array<i64: 1, 128>}, {pipeline_mode = #tpu.pipeline_mode<synchronous>, transform_indices = @transform_3, window_bounds = array<i64: 1, 128>}, {transform_indices = @transform_4, window_bounds = array<i64: 2, 1, 2, 128>}, {transform_indices = @transform_5, window_bounds = array<i64: 2, 1, 2, 128>}, {transform_indices = @transform_6, window_bounds = array<i64: 2, 1, 2, 128>}, {transform_indices = @transform_7, window_bounds = array<i64: 2, 1, 2, 128>}]} {
    %0 = arith.index_cast %arg0 : i32 to index
    %1 = memref.load %arg2[%0] : memref<4xf32, #tpu.memory_space<smem>>
    %c0 = arith.constant 0 : index
    %c0_0 = arith.constant 0 : index
    %2 = vector.load %arg3[%c0, %c0_0] : memref<2x1xf32, #tpu.memory_space<vmem>>, vector<2x1xf32>
    %c0_1 = arith.constant 0 : index
    %c0_2 = arith.constant 0 : index
    %3 = vector.load %arg4[%c0_1, %c0_2] : memref<1x128xf32, #tpu.memory_space<vmem>>, vector<1x128xf32>
    %4 = vector.broadcast %2 : vector<2x1xf32> to vector<2x128xf32>
    %5 = vector.broadcast %3 : vector<1x128xf32> to vector<2x128xf32>
    %6 = arith.addf %4, %5 : vector<2x128xf32>
    %7 = arith.mulf %6, %6 : vector<2x128xf32>
    %c0_3 = arith.constant 0 : index
    %c0_4 = arith.constant 0 : index
    %8 = vector.load %arg5[%c0_3, %c0_4] : memref<1x128xf32, #tpu.memory_space<vmem>>, vector<1x128xf32>
    %9 = vector.broadcast %8 : vector<1x128xf32> to vector<2x128xf32>
    %10 = arith.addf %7, %9 : vector<2x128xf32>
    %11 = vector.broadcast %1 : f32 to vector<2x128xf32>
    %12 = arith.mulf %11, %10 : vector<2x128xf32>
    %13 = math.cos %12 : vector<2x128xf32>
    %14 = vector.shape_cast %13 : vector<2x128xf32> to vector<1x1x2x128xf32>
    %15 = math.sin %12 : vector<2x128xf32>
    %16 = vector.shape_cast %15 : vector<2x128xf32> to vector<1x1x2x128xf32>
    %c0_5 = arith.constant 0 : index
    %c0_6 = arith.constant 0 : index
    %c0_7 = arith.constant 0 : index
    %c0_8 = arith.constant 0 : index
    %17 = vector.load %arg6[%c0_5, %c0_6, %c0_7, %c0_8] : memref<2x1x2x128xf32, #tpu.memory_space<vmem>>, vector<2x1x2x128xf32>
    %c0_9 = arith.constant 0 : index
    %c0_10 = arith.constant 0 : index
    %c0_11 = arith.constant 0 : index
    %c0_12 = arith.constant 0 : index
    %18 = vector.load %arg7[%c0_9, %c0_10, %c0_11, %c0_12] : memref<2x1x2x128xf32, #tpu.memory_space<vmem>>, vector<2x1x2x128xf32>
    %19 = vector.broadcast %14 : vector<1x1x2x128xf32> to vector<2x1x2x128xf32>
    %20 = arith.mulf %17, %19 : vector<2x1x2x128xf32>
    %21 = vector.broadcast %16 : vector<1x1x2x128xf32> to vector<2x1x2x128xf32>
    %22 = arith.mulf %18, %21 : vector<2x1x2x128xf32>
    %23 = arith.subf %20, %22 : vector<2x1x2x128xf32>
    %c0_13 = arith.constant 0 : index
    %c0_14 = arith.constant 0 : index
    %c0_15 = arith.constant 0 : index
    %c0_16 = arith.constant 0 : index
    %24 = vector.load %arg8[%c0_13, %c0_14, %c0_15, %c0_16] : memref<2x1x2x128xf32, #tpu.memory_space<vmem>>, vector<2x1x2x128xf32>
    tpu.vector_store %arg8[%c0_13, %c0_14, %c0_15, %c0_16], %23 {strides = array<i32>} : memref<2x1x2x128xf32, #tpu.memory_space<vmem>>, vector<2x1x2x128xf32>,
    %25 = vector.broadcast %16 : vector<1x1x2x128xf32> to vector<2x1x2x128xf32>
    %26 = arith.mulf %17, %25 : vector<2x1x2x128xf32>
    %27 = vector.broadcast %14 : vector<1x1x2x128xf32> to vector<2x1x2x128xf32>
    %28 = arith.mulf %18, %27 : vector<2x1x2x128xf32>
    %29 = arith.addf %26, %28 : vector<2x1x2x128xf32>
    %c0_17 = arith.constant 0 : index
    %c0_18 = arith.constant 0 : index
    %c0_19 = arith.constant 0 : index
    %c0_20 = arith.constant 0 : index
    %30 = vector.load %arg9[%c0_17, %c0_18, %c0_19, %c0_20] : memref<2x1x2x128xf32, #tpu.memory_space<vmem>>, vector<2x1x2x128xf32>
    tpu.vector_store %arg9[%c0_17, %c0_18, %c0_19, %c0_20], %29 {strides = array<i32>} : memref<2x1x2x128xf32, #tpu.memory_space<vmem>>, vector<2x1x2x128xf32>,
    return
  }
  func.func @transform_0(%arg0: i32, %arg1: i32) -> i32 {
    %c0_i32 = arith.constant 0 : i32
    %c0_i32_0 = arith.constant 0 : i32
    return %c0_i32 : i32
  }
  func.func @transform_1(%arg0: i32, %arg1: i32) -> (i32, i32) {
    %c0_i32 = arith.constant 0 : i32
    %c0_i32_0 = arith.constant 0 : i32
    return %arg1, %c0_i32 : i32, i32
  }
  func.func @transform_2(%arg0: i32, %arg1: i32) -> (i32, i32) {
    %c0_i32 = arith.constant 0 : i32
    %c0_i32_0 = arith.constant 0 : i32
    %c0_i32_1 = arith.constant 0 : i32
    return %c0_i32, %c0_i32_0 : i32, i32
  }
  func.func @transform_3(%arg0: i32, %arg1: i32) -> (i32, i32) {
    %c0_i32 = arith.constant 0 : i32
    %c0_i32_0 = arith.constant 0 : i32
    %c0_i32_1 = arith.constant 0 : i32
    return %c0_i32, %c0_i32_0 : i32, i32
  }
  func.func @transform_4(%arg0: i32, %arg1: i32) -> (i32, i32, i32, i32) {
    %c0_i32 = arith.constant 0 : i32
    %c0_i32_0 = arith.constant 0 : i32
    %c0_i32_1 = arith.constant 0 : i32
    return %c0_i32, %arg0, %arg1, %c0_i32_0 : i32, i32, i32, i32
  }
  func.func @transform_5(%arg0: i32, %arg1: i32) -> (i32, i32, i32, i32) {
    %c0_i32 = arith.constant 0 : i32
    %c0_i32_0 = arith.constant 0 : i32
    %c0_i32_1 = arith.constant 0 : i32
    return %c0_i32, %arg0, %arg1, %c0_i32_0 : i32, i32, i32, i32
  }
  func.func @transform_6(%arg0: i32, %arg1: i32) -> (i32, i32, i32, i32) {
    %c0_i32 = arith.constant 0 : i32
    %c0_i32_0 = arith.constant 0 : i32
    %c0_i32_1 = arith.constant 0 : i32
    return %c0_i32, %arg0, %arg1, %c0_i32_0 : i32, i32, i32, i32
  }
  func.func @transform_7(%arg0: i32, %arg1: i32) -> (i32, i32, i32, i32) {
    %c0_i32 = arith.constant 0 : i32
    %c0_i32_0 = arith.constant 0 : i32
    %c0_i32_1 = arith.constant 0 : i32
    return %c0_i32, %arg0, %arg1, %c0_i32_0 : i32, i32, i32, i32
  }
}

</mosaic_0001>

<bundles_post_ra>
// kernel: tpu_custom_call.1
= control target key start
LH: loop header
LB: loop body
LE: loop exit
PB: predicated region body
PF: predicated region fallthrough
CT: control target
= control target key end

     0   :  { %s1606_s0 = inlined_call_operand.vmem [shape: f32[4], index: 0, kind: input, shape index: {}]   ;;  %s1607_s1 = inlined_call_operand.vmem [shape: f32[2,1], index: 1, kind: input, shape index: {}]   ;;  %s1608_s2 = inlined_call_operand.vmem [shape: f32[1,128], index: 2, kind: input, shape index: {}]   ;;  %s1609_s3 = inlined_call_operand.hbm [shape: f32[1,128], index: 3, kind: input, shape index: {}]   ;;  %s1610_s4 = inlined_call_operand.vmem [shape: f32[2,4,2,128], index: 4, kind: input, shape index: {}]   ;;  %s1611_s5 = inlined_call_operand.hbm [shape: f32[2,4,2,128], index: 5, kind: input, shape index: {}]   ;;  %s1612_s6 = inlined_call_operand.hbm [shape: f32[2,4,2,128], index: 6, kind: output, shape index: {0}]   ;;  %s1613_s7 = inlined_call_operand.hbm [shape: f32[2,4,2,128], index: 7, kind: output, shape index: {1}]  }
   0x1   :  { %1619 = sst [smem:[#allocation19_spill]] %s1606_s0 }
   0x2   :  { %1620 = sst [smem:[#allocation20_spill]] %s1609_s3 }
   0x3   :  { %13 = vsyncpa [#allocation5], 0 }
   0x4   :  { %14 = vsyncpa [#allocation3], 0 }
   0x5   :  { %15 = vsyncpa [#allocation9], 0 }
   0x6   :  { %17 = vsyncpa [#allocation9 + $0x1], 0 }
   0x7   :  { %18 = vsyncpa [#allocation4], 0 }
   0x8   :  { %20 = vsyncpa [#allocation4 + $0x1], 0 }
   0x9   :  { %21 = vsyncpa [#allocation12], 0 }
   0xa   :  { %23 = vsyncpa [#allocation12 + $0x1], 0  ;;  %s1284_s24 = smov 0   ;;  %s1286_s25 = smov 0  }
   0xb   :  { %s1288_s26 = smov 0   ;;  %s1290_s27 = smov 0  }
   0xc   :  { %s1292_s28 = smov 0   ;;  %s1294_s29 = smov 0  }
   0xd LB: > { %s892_s30 = sadd.s32 4294967295, %s1224_s29   ;;  %s893_s8 = sadd.s32 4294967294, %s1224_s29   ;;  %s1224_s29 = sphi %s1294_s29, %s29_s29   ;;  %s1220_s28 = sphi %s1292_s28, %s1640_s28   ;;  %s1216_s27 = sphi %s1290_s27, %s1639_s27   ;;  %s1212_s26 = sphi %s1288_s26, %s1638_s26   ;;  %s1208_s25 = sphi %s1286_s25, %s1637_s25   ;;  %s1204_s24 = sphi %s1284_s24, %s1636_s24  }
   0xe   : > { %s41_s9 = sadd.s32 1, %s1220_s28  ;;  %s139_s10 = sadd.s32 1, %s1212_s26 }
   0xf   : > { %p43_p0 = scmp.ge.s32.totalorder %s41_s9, 4  ;;  %p146_p1 = scmp.ne.s32.totalorder %s1212_s26, %s1208_s25 }
  0x10   : > { %p147_p2 = scmp.eq.s32.totalorder %s1224_s29, 0  ;;  %p180_p3 = scmp.ne.s32.totalorder %s1208_s25, %s1204_s24 }
  0x11   : > { %s1642_s9 = smov (%p43_p0, %s41_s9), 0  ;;  %p1329_p5 = scmp.eq.s32.totalorder %s892_s30, 0 }
  0x12   : > { %1621 = sst [smem:[#allocation18_spill]] %s1642_s9  ;;  %p1325_p4 = por %p147_p2, %p146_p1 }
  0x13   : > { %s1623_s12 = scalar_select %p1329_p5, 1, 0 }
  0x14   : > { %s134_s13 = ssub.s32 %s1220_s28, %s1642_s9  ;;  %p206_p6 = scmp.eq.s32.totalorder %s892_s30, 3 }
  0x15   : > { %p137_p7 = scmp.eq.s32.totalorder %s134_s13, 0  ;;  %p1337_p8 = por %p1329_p5, %p180_p3 }
  0x16   : > { %p1341_p9 = por %p206_p6, %p146_p1  ;;  %p212_p10 = scmp.eq.s32.totalorder %s893_s8, 3 }
  0x17   : > { %s1624_s14 = scalar_select %p1337_p8, 1, 0 }
  0x18   : > { %s1625_s15 = scalar_select %p1341_p9, 1, 0 }
  0x19   : > { %s1346_s16 = scalar_select %p137_p7, %s1212_s26, %s139_s10  }
  0x1a   : > { %p1348_p11 = por %p212_p10, %p180_p3  ;;  %p894_p12 = scmp.ge.s32.totalorder %s1224_s29, 1 }
  0x1b   : > { %p247_p13 = scmp.lt.s32.totalorder %s1224_s29, 5  ;;  %s1628_s0 = sld [smem:[#allocation19_spill]] }
  0x1c   : > { %s1626_s17 = scalar_select %p1348_p11, 1, 0 }
  0x1d   : > { %p1354_p0 = pnand %p894_p12, %p247_p13  ;;  %s1226_s22 = smov [#allocation6]  }
  0x1e   : > { %s281_s23 = sshll.u32 %s1226_s22, 4  ;;  %s1369_s23 = int_to_ptr.vmem [resolvable:$true] %s281_s23 }
  0x1f   : > { %p944_p1 = pneg %p1354_p0 }
  0x21   : > { %s260_s21 = sshll.u32 %s1628_s0, 4  ;;  %p1365_p2 = pnand %p944_p1, %p1329_p5  ;;  %s261_s21 = int_to_ptr.vmem [resolvable:$true] %s260_s21 }
  0x22   : > { %s1031_s8 = scalar_lea.vmem %s261_s21, 16  ;;  %p1039_p12 = scmp.lt.s32.totalorder %s261_s21, %s261_s21 }
  0x23   : > { %p1032_p3 = scmp.ne.s32.totalorder %s261_s21, %s1031_s8  ;;  %p1033_p6 = pneg %p1365_p2 }
  0x24   : > { %p1040_p13 = scmp.lt.s32.totalorder %s1031_s8, %s1031_s8 }
  0x25   : > { %p1034_p7 = pnand %p1033_p6, %p1032_p3 }
  0x26   : > { %p1041_p11 = por %p1040_p13, %p1039_p12 }
  0x27   : > { %p1035_p10 = pneg %p1034_p7 }
  0x29   : > { %p1042_p9 = pnand %p1041_p11, %p1035_p10 }
  0x2b   : > { %1045 = shalt.err (!%p1042_p9)
}
  0x2c   : > { %s1227_s10 = smov [#allocation2]   ;;  %s1630_s3 = sld [smem:[#allocation20_spill]] }
  0x2d   : > { %947 = dma.vmem_to_smem (!%p1365_p2), %s261_s21, 16, %s1227_s10, [#allocation5]  }
  0x32   : > { %s1046_s20 = scalar_lea.hbm %s1630_s3, 16 }
  0x33   : > { %p1047_p1 = scmp.ne.s32.totalorder %s1630_s3, %s1046_s20  ;;  %p1053_p9 = scmp.lt.u32.totalorder %s1046_s20, %s1630_s3 }
  0x35   : > { %p1049_p3 = pnand %p1047_p1, %p1033_p6 }
  0x37   : > { %p1050_p7 = pneg %p1049_p3 }
  0x39   : > { %p1055_p11 = pnand %p1053_p9, %p1050_p7 }
  0x3b   : > { %1058 = shalt.err (!%p1055_p11)
}
  0x3c   : > { %s1059_s21 = scalar_lea.vmem %s1369_s23, 16  ;;  %s1066_s0 = scalar_lea.vmem %s1369_s23, 32 }
  0x3d   : > { %p1060_p10 = scmp.ne.s32.totalorder %s1369_s23, %s1059_s21  ;;  %p1067_p1 = scmp.lt.s32.totalorder %s1369_s23, %s1369_s23 }
  0x3e   : > { %p1068_p3 = scmp.lt.s32.totalorder %s1066_s0, %s1059_s21 }
  0x3f   : > { %p1062_p12 = pnand %p1060_p10, %p1033_p6 }
  0x40   : > { %p1069_p8 = por %p1068_p3, %p1067_p1 }
  0x41   : > { %p1063_p13 = pneg %p1062_p12 }
  0x43   : > { %p1070_p5 = pnand %p1069_p8, %p1063_p13 }
  0x45   : > { %1073 = shalt.err (!%p1070_p5)
}
  0x46   : > { %950 = dma.hbm_to_vmem [thread:$0]  (!%p1365_p2), %s1630_s3, 16, %s1369_s23, [#allocation3]  }
  0x47   : > { %p898_p7 = scmp.ge.s32.totalorder %s1224_s29, 4 }
  0x49   : > { %288 = sbr.rel (%p898_p7) target bundleno = 114 (0x72), region = 32 }
  0x50   : > { %291 = sbr.rel (!%p1325_p4) target bundleno = 87 (0x57), region = 36  ;;  %s293_s13 = sand.u32 (%p1325_p4), 1, %s1212_s26  }
  0x51   : > { %s900_s19 = sshll.u32 (%p1325_p4), %s1220_s28, 1  ;;  %s899_s20 = sshll.u32 (%p1325_p4), %s293_s13, 2 }
  0x52   : > { %s298_s30 = scalar_lea.vmem (%p1325_p4), %s1610_s4, %s900_s19  ;;  %s295_s21 = scalar_lea.vmem (%p1325_p4), [#allocation7], %s899_s20 }
  0x53   : > { %v314_v0 = vld [vmem:[%s298_s30] sm:$0x3] (%p1325_p4)  ;;  %v316_v1 = vld [vmem:[%s298_s30 + $0x8] sm:$0x3] (%p1325_p4) }
  0x54   : > { %315 = vst [vmem:[%s295_s21] sm:$0x3] (%p1325_p4), %v314_v0  ;;  %317 = vst [vmem:[%s295_s21 + $0x2] sm:$0x3] (%p1325_p4), %v316_v1 }
  0x57 PF: > { %s337_s23 = sand.u32 1, %s1212_s26   ;;  %s902_s0 = sshll.u32 %s1220_s28, 5 }
  0x58   : > { %s901_s9 = sshll.u32 %s337_s23, 2  ;;  %s1417_s13 = scalar_lea.hbm %s1611_s5, %s902_s0 }
  0x59   : > { %s341_s19 = scalar_lea.vmem [#allocation8], %s901_s9  ;;  %s1421_s22 = scalar_lea.sflag [#allocation9], %s337_s23 }
  0x5a   : > { %s348_s20 = sshll.u32 %s341_s19, 4  ;;  %s1074_s8 = scalar_lea.hbm %s1417_s13, 64  ;;  %s1419_s20 = int_to_ptr.vmem [resolvable:$true] %s348_s20 }
  0x5b   : > { %p1075_p5 = scmp.ne.s32.totalorder %s1417_s13, %s1074_s8  ;;  %s1078_s3 = scalar_lea.hbm %s1611_s5, 256 }
  0x5c   : > { %p1079_p6 = scmp.lt.u32.totalorder %s1417_s13, %s1611_s5  ;;  %p1080_p9 = scmp.lt.u32.totalorder %s1078_s3, %s1074_s8 }
  0x5d   : > { %p1076_p8 = pnand %p1075_p5, %p1325_p4  ;;  %p1082_p10 = scmp.lt.u32.totalorder %s1074_s8, %s1417_s13 }
  0x5e   : > { %p1081_p11 = por %p1080_p9, %p1079_p6 }
  0x5f   : > { %p1077_p2 = pneg %p1076_p8 }
  0x60   : > { %p1083_p12 = por %p1082_p10, %p1081_p11 }
  0x62   : > { %p1084_p13 = pnand %p1083_p12, %p1077_p2 }
  0x64   : > { %1087 = shalt.err (!%p1084_p13)
}
  0x65   : > { %s1088_s23 = scalar_lea.vmem %s1419_s20, 64  ;;  %s1228_s9 = smov [#allocation8]  }
  0x66   : > { %p1089_p1 = scmp.ne.s32.totalorder %s1419_s20, %s1088_s23  ;;  %s1092_s19 = sshll.u32 %s1228_s9, 4  ;;  %s1093_s19 = int_to_ptr.vmem [resolvable:$false] %s1092_s19 }
  0x67   : > { %s1094_s30 = scalar_lea.vmem %s1093_s19, 128  ;;  %p1095_p5 = scmp.lt.s32.totalorder %s1419_s20, %s1093_s19 }
  0x68   : > { %p1090_p3 = pnand %p1089_p1, %p1325_p4  ;;  %p1096_p8 = scmp.lt.s32.totalorder %s1094_s30, %s1088_s23 }
  0x6a   : > { %p1091_p7 = pneg %p1090_p3  ;;  %p1097_p6 = por %p1096_p8, %p1095_p5 }
  0x6c   : > { %p1098_p9 = pnand %p1097_p6, %p1091_p7 }
  0x6e   : > { %1101 = shalt.err (!%p1098_p9)
}
  0x6f   : > { %s1229_s8 = smov 128   ;;  %s1230_s21 = smov 32  }
  0x70   : > { %s1231_s3 = smov 2  }
  0x71   : > { %934 = dma.hbm_to_vmem [thread:$0]  (%p1325_p4), %s1417_s13, 64, %s1419_s20, %s1421_s22, %s1229_s8, %s1230_s21, %s1231_s3  }
  0x72 PF: > { %360 = sbr.rel (%p1354_p0) target bundleno = 389 (0x185), region = 74  ;;  %p1631_p2 = scmp.ne.s32.totalorder (!%p1354_p0), %s1623_s12, 0 }
  0x79   : > { %1183 = dma.done.wait (%p1631_p2), [#allocation5], 16  }
  0x7a   : > { %1185 = vsyncadd (%p1631_p2), [#allocation5], 4294967280 }
  0x7b   : > { %1187 = dma.done.wait (%p1631_p2), [#allocation3], 16  }
  0x7c   : > { %1189 = vsyncadd (%p1631_p2), [#allocation3], 4294967280  ;;  %s1456_s11 = sand.u32 1, %s1208_s25   ;;  %p1632_p4 = scmp.ne.s32.totalorder %s1624_s14, 0 }
  0x7d   : > { %s1459_s18 = sshll.u32 %s1456_s11, 2  ;;  %s378_s20 = scalar_lea.sflag [#allocation9], %s1456_s11 }
  0x7e   : > { %s373_s13 = scalar_lea.vmem [#allocation7], %s1459_s18  ;;  %s381_s22 = scalar_lea.vmem [#allocation8], %s1459_s18 }
  0x7f   : > { %1191 = dma.done.wait (%p1632_p4), %s378_s20, 64  }
  0x80   : > { %1193 = vsyncadd (%p1632_p4), %s378_s20, 4294967232 }
  0x81   : > { %386 = sfence }
  0x82   : > { %v431_v2 = vld [vmem:[%s1607_s1] sm:$0x3]  ;;  %v1232_v3 = vmov 0   ;;  %s430_s10 = sld [smem:[#allocation2 + %s1216_s27]]  ;;  %v1233_v22 = vmov 683565275  }
  0x83   : > { %1026 = vset.pattern.permute.xlu0 %v1232_v3  ;;  %v910_v4 = vld [vmem:[%s1608_s2] ss:$0 sm:$0xff]  ;;  %v1234_v24 = vmov 2475754826   ;;  %v1235_v27 = vmov 2131351028  }
  0x84   : > { %435 = vperm.xlu0 %1026, %v431_v2   ;;  %v911_v7 = vld [vmem:[#allocation6] ss:$0 sm:$0xff]  ;;  %v1236_v30 = vmov 2102212464   ;;  %v1237_v33 = vmov 920167782  }
  0x85   : > { %v1238_v36 = vmov 1326507024   ;;  %s922_s14 = sshll.u32 %s1216_s27, 5  ;;  %s418_s19 = scalar_lea.vmem [#allocation10], %s1459_s18 }
  0x86   : > { %s702_s30 = sshll.u32 %s418_s19, 4  ;;  %s1511_s3 = scalar_lea.hbm %s1612_s6, %s922_s14  ;;  %s1513_s30 = int_to_ptr.vmem [resolvable:$true] %s702_s30 }
  0x87   : > { %s1524_s0 = scalar_lea.hbm %s1613_s7, %s922_s14  ;;  %p1633_p11 = scmp.ne.s32.totalorder %s1625_s15, 0 }
  0x88   : > { %v454_v9 = vstv %s430_s10  ;;  %s1102_s10 = scalar_lea.vmem %s1513_s30, 64  ;;  %s1239_s23 = smov [#allocation10]  }
  0x89   : > { %p1103_p0 = scmp.ne.s32.totalorder %s1513_s30, %s1102_s10  ;;  %s1106_s9 = sshll.u32 %s1239_s23, 4  ;;  %s1107_s9 = int_to_ptr.vmem [resolvable:$false] %s1106_s9 }
  0x8a   : > { %s1108_s8 = scalar_lea.vmem %s1107_s9, 128  ;;  %p1109_p13 = scmp.lt.s32.totalorder %s1513_s30, %s1107_s9 }
  0x8b   : > { %p1104_p10 = pnand %p1103_p0, %p1633_p11  ;;  %p1110_p1 = scmp.lt.s32.totalorder %s1108_s8, %s1102_s10 }
  0x8d   : > { %p1105_p12 = pneg %p1104_p10  ;;  %p1111_p3 = por %p1110_p1, %p1109_p13 }
  0x8f   : > { %p1112_p7 = pnand %p1111_p3, %p1105_p12 }
 0x103   : > { %v436_v5 = vpop.permute.xlu0 %435 }
 0x104   : > { %v444_v6 = vadd.f32 %v910_v4, %v436_v5 }
 0x106   : > { %v445_v8 = vmul.f32 %v444_v6, %v444_v6 }
 0x108   : > { %v453_v10 = vadd.f32 %v911_v7, %v445_v8 }
 0x10a   : > { %v1475_v11 = vmul.f32 %v454_v9, %v453_v10 }
 0x10c   : > { %v459_v12 = vand.u32 2139095040, %v1475_v11  ;;  %v456_v16 = vand.u32 2147483647, %v1475_v11  ;;  %vm458_vm7 = vcmp.lt.s32.totalorder %v1475_v11, 0  ;;  %vm548_vm15 = vweird.f32 %v1475_v11 }
 0x10e   : > { %v460_v13 = vshrl.u32 %v459_v12, 23  ;;  %v463_v19 = vand.u32 8388607, %v456_v16  ;;  %vm457_vm8 = vcmp.le.f32.partialorder %v456_v16, 0.7853982 }
 0x10f   : > { %v663_v16 = vld [vmem:[%s373_s13] sm:$0x3] }
 0x110   : > { %v912_v14 = vadd.s32 4294967169, %v460_v13  ;;  %v464_v38 = vor.u32 8388608, %v463_v19 }
 0x112   : > { %v466_v15 = vadd.s32 1, %v912_v14  ;;  %v504_v52 = vshll.u32 %v464_v38, 8  ;;  %v664_v38 = vld [vmem:[%s373_s13 + $0x2] sm:$0x3]  ;;  %s1516_s13 = scalar_lea.vmem [#allocation11], %s1459_s18  ;;  %s684_s18 = scalar_lea.sflag [#allocation4], %s1456_s11 }
 0x113   : > { %s718_s20 = sshll.u32 %s1516_s13, 4  ;;  %s1526_s20 = int_to_ptr.vmem [resolvable:$true] %s718_s20 }
 0x114   : > { %vm467_vm0 = vcmp.gt.s32.totalorder %v466_v15, 0 }
 0x115   : > { %v468_v17 = vsel %vm467_vm0, %v466_v15, 0 }
 0x116   : > { %v470_v18 = vand.u32 31, %v468_v17  ;;  %v469_v21 = vshrl.u32 %v468_v17, 5 }
 0x118   : > { %v471_v20 = vsub.s32 32, %v470_v18  ;;  %v473_v23 = vshll.u32 %v1233_v22, %v470_v18  ;;  %v476_v25 = vshll.u32 %v1234_v24, %v470_v18  ;;  %v479_v29 = vshll.u32 %v1235_v27, %v470_v18 }
 0x119   : > { %v482_v32 = vshll.u32 %v1236_v30, %v470_v18  ;;  %v485_v35 = vshll.u32 %v1237_v33, %v470_v18  ;;  %vm488_vm1 = vcmp.lt.s32.totalorder %v469_v21, 1  ;;  %vm491_vm2 = vcmp.lt.s32.totalorder %v469_v21, 4 }
 0x11a   : > { %v474_v26 = vshrl.u32 %v1234_v24, %v471_v20  ;;  %v477_v28 = vshrl.u32 %v1235_v27, %v471_v20  ;;  %v480_v31 = vshrl.u32 %v1236_v30, %v471_v20  ;;  %v483_v34 = vshrl.u32 %v1237_v33, %v471_v20 }
 0x11b   : > { %v486_v37 = vshrl.u32 %v1238_v36, %v471_v20  ;;  %v472_v47 = vshrl.u32 %v1233_v22, %v471_v20  ;;  %vm490_vm3 = vcmp.lt.s32.totalorder %v469_v21, 3  ;;  %vm489_vm4 = vcmp.lt.s32.totalorder %v469_v21, 2 }
 0x11c   : > { %v475_v39 = vor.u32 %v474_v26, %v473_v23  ;;  %v478_v40 = vor.u32 %v477_v28, %v476_v25  ;;  %v481_v41 = vor.u32 %v480_v31, %v479_v29  ;;  %v484_v42 = vor.u32 %v483_v34, %v482_v32 }
 0x11d   : > { %v487_v43 = vor.u32 %v486_v37, %v485_v35 }
 0x11e   : > { %v493_v44 = vsel %vm491_vm2, %v481_v41, 2102212464  ;;  %v496_v45 = vsel %vm488_vm1, %v475_v39, %v478_v40  ;;  %v500_v46 = vsel %vm488_vm1, %v478_v40, %v481_v41  ;;  %v497_v48 = vsel %vm491_vm2, %v484_v42, 920167782 }
 0x11f   : > { %v501_v49 = vsel %vm491_vm2, %v487_v43, 1326507024  ;;  %v498_v50 = vsel %vm490_vm3, %v481_v41, %v497_v48  ;;  %v492_v53 = vsel %vm488_vm1, %v472_v47, %v475_v39  ;;  %v494_v54 = vsel %vm490_vm3, %v478_v40, %v493_v44  ;;  %v665_v41 = vld [vmem:[%s381_s22] sm:$0x3]  ;;  %v666_v44 = vld [vmem:[%s381_s22 + $0x2] sm:$0x3] }
 0x120   : > { %v502_v51 = vsel %vm490_vm3, %v484_v42, %v501_v49  ;;  %v499_v55 = vsel %vm489_vm4, %v496_v45, %v498_v50  ;;  %v495_v61 = vsel %vm489_vm4, %v492_v53, %v494_v54 }
 0x121   : > { %v503_v56 = vsel %vm489_vm4, %v500_v46, %v502_v51  ;;  %v1484_v59 = vmul.u32.u64.low %v504_v52, %v499_v55  ;;  %v1485_v60 = vmul.u32.u64.high %v504_v52, %v499_v55, %v1484_v59  ;;  %v511_v63 = vmul.u32 %v504_v52, %v495_v61 }
 0x122   : > { %v1481_v57 = vmul.u32.u64.low %v504_v52, %v503_v56  ;;  %v1482_v58 = vmul.u32.u64.high %v504_v52, %v503_v56, %v1481_v57 }
 0x123   : > { %v514_v62 = vadd.s32 1, %v1485_v60 }
 0x124   : > { %vm513_vm5 = vc.u32 %v1482_v58, %v1484_v59  ;;  %v512_v12 = vadd.s32 %v1484_v59, %v1482_v58 }
 0x125   : > { %v515_v0 = vsel %vm513_vm5, %v514_v62, %v1485_v60 }
 0x126   : > { %v516_v1 = vadd.s32 %v515_v0, %v511_v63 }
 0x128   : > { %v517_v2 = vadd.s32 536870912, %v516_v1 }
 0x12a   : > { %v518_v3 = vshrl.u32 %v517_v2, 30 }
 0x12c   : > { %v519_v4 = vshll.u32 %v518_v3, 30  ;;  %v542_v25 = vsub.s32 4, %v518_v3 }
 0x12e   : > { %v520_v5 = vsub.s32 %v516_v1, %v519_v4  ;;  %v543_v28 = vsel %vm458_vm7, %v542_v25, %v518_v3 }
 0x12f   : > { %v545_v30 = vsel %vm457_vm8, 0, %v543_v28 }
 0x130   : > { %v522_v6 = vsub.s32 0, %v520_v5  ;;  %v652_v31 = vadd.s32 3, %v545_v30  ;;  %v549_v32 = vand.u32 3, %v545_v30 }
 0x132   : > { %v913_v7 = vmin.u32 %v522_v6, %v520_v5  ;;  %v653_v33 = vand.u32 3, %v652_v31  ;;  %vm554_vm9 = vcmp.eq.s32.totalorder %v549_v32, 2  ;;  %vm551_vm11 = vcmp.eq.s32.totalorder %v549_v32, 0 }
 0x133   : > { %vm550_vm13 = vcmp.lt.s32.totalorder %v549_v32, 2 }
 0x134   : > { %v524_v8 = vclz %v913_v7  ;;  %vm658_vm10 = vcmp.eq.s32.totalorder %v653_v33, 2  ;;  %vm655_vm12 = vcmp.eq.s32.totalorder %v653_v33, 0  ;;  %vm654_vm14 = vcmp.lt.s32.totalorder %v653_v33, 2 }
 0x136   : > { %v914_v9 = vadd.s32 4294967294, %v524_v8 }
 0x138   : > { %vm915_vm6 = vcmp.lt.s32.totalorder %v914_v9, 0 }
 0x139   : > { %v527_v10 = vsel %vm915_vm6, 0, %v914_v9 }
 0x13a   : > { %v528_v13 = vsub.s32 32, %v527_v10  ;;  %v532_v14 = vsub.s32 4294967266, %v527_v10  ;;  %v529_v15 = vshll.u32 %v520_v5, %v527_v10 }
 0x13c   : > { %v530_v17 = vshrl.u32 %v512_v12, %v528_v13  ;;  %v533_v18 = vadd.s32 127, %v532_v14 }
 0x13e   : > { %v531_v19 = vor.u32 %v530_v17, %v529_v15  ;;  %v534_v20 = vshll.u32 %v533_v18, 23 }
 0x140   : > { %v535_v21 = vor.u32 4788187, %v534_v20  ;;  %v538_v23 = vcvt.s32.f32 %v531_v19 }
 0x142   : > { %v536_v22 = vand.u32 2147483647, %v535_v21 }
 0x144   : > { %v539_v24 = vmul.f32 %v538_v23, %v536_v22 }
 0x146   : > { %v540_v26 = vxor.u32 2147483648, %v539_v24 }
 0x148   : > { %v541_v27 = vsel %vm458_vm7, %v540_v26, %v539_v24 }
 0x149   : > { %v544_v29 = vsel %vm457_vm8, %v1475_v11, %v541_v27 }
 0x14a   : > { %1027 = vcosq.f32 %v544_v29 }
 0x14b   : > { %1029 = vsinq.f32 %v544_v29 }
 0x154   : > { %v1028_v34 = vpop.eup %1027 }
 0x155   : > { %v1030_v35 = vpop.eup %1029  ;;  %v555_v36 = vxor.u32 2147483648, %v1028_v34 }
 0x156   : > { %v552_v37 = vxor.u32 2147483648, %v1030_v35 }
 0x157   : > { %v556_v39 = vsel %vm554_vm9, %v555_v36, %v1030_v35  ;;  %v660_v40 = vsel %vm658_vm10, %v555_v36, %v1030_v35 }
 0x158   : > { %v553_v42 = vsel %vm551_vm11, %v1028_v34, %v552_v37  ;;  %v657_v43 = vsel %vm655_vm12, %v1028_v34, %v552_v37 }
 0x159   : > { %v557_v45 = vsel %vm550_vm13, %v553_v42, %v556_v39  ;;  %v661_v46 = vsel %vm654_vm14, %v657_v43, %v660_v40 }
 0x15a   : > { %v558_v47 = vsel %vm548_vm15, nan, %v557_v45  ;;  %v662_v48 = vsel %vm548_vm15, nan, %v661_v46 }
 0x15b   : > { %v667_v49 = vmul.f32 %v663_v16, %v558_v47  ;;  %v668_v50 = vmul.f32 %v664_v38, %v558_v47  ;;  %v669_v51 = vmul.f32 %v665_v41, %v662_v48  ;;  %v670_v52 = vmul.f32 %v666_v44, %v662_v48 }
 0x15c   : > { %v675_v11 = vmul.f32 %v663_v16, %v662_v48  ;;  %v676_v53 = vmul.f32 %v664_v38, %v662_v48  ;;  %v677_v54 = vmul.f32 %v665_v41, %v558_v47  ;;  %v678_v55 = vmul.f32 %v666_v44, %v558_v47 }
 0x15d   : > { %v671_v56 = vsub.f32 %v667_v49, %v669_v51  ;;  %v672_v57 = vsub.f32 %v668_v50, %v670_v52 }
 0x15e   : > { %v679_v58 = vadd.f32 %v677_v54, %v675_v11  ;;  %v680_v59 = vadd.f32 %v678_v55, %v676_v53 }
 0x15f   : > { %673 = vst [vmem:[%s418_s19] sm:$0x3] %v671_v56  ;;  %674 = vst [vmem:[%s418_s19 + $0x2] sm:$0x3] %v672_v57 }
 0x160   : > { %1115 = shalt.err (!%p1112_p7)
}
 0x161   : > { %s1116_s27 = scalar_lea.hbm %s1511_s3, 64  ;;  %s1120_s21 = scalar_lea.hbm %s1612_s6, 256 }
 0x162   : > { %p1117_p5 = scmp.ne.s32.totalorder %s1511_s3, %s1116_s27  ;;  %p1121_p9 = scmp.lt.u32.totalorder %s1511_s3, %s1612_s6 }
 0x163   : > { %p1122_p2 = scmp.lt.u32.totalorder %s1120_s21, %s1116_s27  ;;  %p1124_p0 = scmp.lt.u32.totalorder %s1116_s27, %s1511_s3 }
 0x164   : > { %p1118_p8 = pnand %p1117_p5, %p1633_p11 }
 0x165   : > { %p1123_p4 = por %p1122_p2, %p1121_p9 }
 0x166   : > { %p1119_p6 = pneg %p1118_p8 }
 0x167   : > { %p1125_p10 = por %p1124_p0, %p1123_p4 }
 0x169   : > { %p1126_p12 = pnand %p1125_p10, %p1119_p6 }
 0x16b   : > { %1129 = shalt.err (!%p1126_p12)
}
 0x16c   : > { %s1240_s10 = smov 32   ;;  %s1241_s23 = smov 128   ;;  %681 = vst [vmem:[%s1516_s13] sm:$0x3] %v679_v58  ;;  %682 = vst [vmem:[%s1516_s13 + $0x2] sm:$0x3] %v680_v59 }
 0x16d   : > { %s1242_s9 = smov 2   ;;  %s689_s8 = scalar_lea.sflag [#allocation12], %s1456_s11 }
 0x16e   : > { %940 = dma.vmem_to_hbm [thread:$0]  (%p1633_p11), %s1513_s30, 64, %s1511_s3, %s684_s18, %s1240_s10, %s1241_s23, %s1242_s9  }
 0x16f   : > { %s1130_s27 = scalar_lea.vmem %s1526_s20, 64  ;;  %s1243_s14 = smov [#allocation11]  }
 0x170   : > { %p1131_p13 = scmp.ne.s32.totalorder %s1526_s20, %s1130_s27  ;;  %s1134_s19 = sshll.u32 %s1243_s14, 4  ;;  %s1135_s19 = int_to_ptr.vmem [resolvable:$false] %s1134_s19 }
 0x171   : > { %s1136_s21 = scalar_lea.vmem %s1135_s19, 128  ;;  %p1137_p7 = scmp.lt.s32.totalorder %s1526_s20, %s1135_s19 }
 0x172   : > { %p1132_p1 = pnand %p1131_p13, %p1633_p11  ;;  %p1138_p5 = scmp.lt.s32.totalorder %s1136_s21, %s1130_s27 }
 0x174   : > { %p1133_p3 = pneg %p1132_p1  ;;  %p1139_p8 = por %p1138_p5, %p1137_p7 }
 0x176   : > { %p1140_p6 = pnand %p1139_p8, %p1133_p3 }
 0x178   : > { %1143 = shalt.err (!%p1140_p6)
}
 0x179   : > { %s1144_s30 = scalar_lea.hbm %s1524_s0, 64  ;;  %s1148_s18 = scalar_lea.hbm %s1613_s7, 256 }
 0x17a   : > { %p1145_p9 = scmp.ne.s32.totalorder %s1524_s0, %s1144_s30  ;;  %p1149_p0 = scmp.lt.u32.totalorder %s1524_s0, %s1613_s7 }
 0x17b   : > { %p1150_p10 = scmp.lt.u32.totalorder %s1148_s18, %s1144_s30  ;;  %p1152_p13 = scmp.lt.u32.totalorder %s1144_s30, %s1524_s0 }
 0x17c   : > { %p1146_p2 = pnand %p1145_p9, %p1633_p11 }
 0x17d   : > { %p1151_p12 = por %p1150_p10, %p1149_p0 }
 0x17e   : > { %p1147_p4 = pneg %p1146_p2 }
 0x17f   : > { %p1153_p1 = por %p1152_p13, %p1151_p12 }
 0x181   : > { %p1154_p3 = pnand %p1153_p1, %p1147_p4 }
 0x183   : > { %1157 = shalt.err (!%p1154_p3)
}
 0x184   : > { %941 = dma.vmem_to_hbm [thread:$0]  (%p1633_p11), %s1526_s20, 64, %s1524_s0, %s689_s8, %s1240_s10, %s1241_s23, %s1242_s9  }
 0x185 PF: > { %p962_p7 = scmp.ge.s32.totalorder %s1224_s29, 2  ;;  %s733_s27 = sand.u32 1, %s1204_s24  }
 0x186   : > { %p1634_p5 = scmp.ne.s32.totalorder %s1626_s17, 0  ;;  %s734_s14 = scalar_lea.sflag [#allocation4], %s733_s27 }
 0x188   : > { %p952_p8 = pnand %p962_p7, %p1634_p5 }
 0x18a   : > { %1195 = dma.done.wait (!%p952_p8), %s734_s14, 64  }
 0x18b   : > { %1197 = vsyncadd (!%p952_p8), %s734_s14, 4294967232  ;;  %s743_s15 = scalar_lea.sflag [#allocation12], %s733_s27 }
 0x18c   : > { %1199 = dma.done.wait (!%p952_p8), %s743_s15, 64  }
 0x18d   : > { %1201 = vsyncadd (!%p952_p8), %s743_s15, 4294967232  ;;  %s29_s29 = sadd.s32 1, %s1224_s29   ;;  %s1635_s11 = sld [smem:[#allocation18_spill]] }
 0x18e   : > { %p26_p6 = scmp.ge.s32.totalorder %s29_s29, 6   ;;  %s1636_s24 = smov %s1208_s25 }
 0x18f   : > { %s1637_s25 = smov %s1212_s26  ;;  %s1638_s26 = smov %s1346_s16 }
 0x190   : > { %s1639_s27 = smov %s1220_s28  ;;  %28 = sbr.rel (!%p26_p6) target bundleno = 13 (0xd), region = 161 }
 0x193   : > { %s1640_s28 = smov %s1635_s11 }
 0x197   :  { %748 = vsyncpa [#allocation3], 1 }
 0x198   :  { %750 = vsyncpa [#allocation3 + $0x1], 1 }
 0x199   :  { %751 = vsyncpa [#allocation9], 1 }
 0x19a   :  { %753 = vsyncpa [#allocation9 + $0x1], 1 }
 0x19b   :  { %754 = vsyncpa [#allocation4], 1 }
 0x19c   :  { %756 = vsyncpa [#allocation4 + $0x1], 1 }
 0x19d   :  { %757 = vsyncpa [#allocation12], 1 }
 0x19e   :  { %759 = vsyncpa [#allocation12 + $0x1], 1 }
 0x19f   :  { %760 = vsyncpa [#allocation5], 1 }
 0x1a0   :  { %762 = vsyncpa [#allocation5 + $0x1], 1 }

</bundles_post_ra>
